<compile_context>
chip_gen: v7x
topology: tpu7x:2x2x1
jax: 0.10.0
libtpu: 0.0.40
codegen_flags: <defaults>
</compile_context>

<pallas_src>
import jax
import jax.numpy as jnp
from jax.experimental import pallas as pl
from jax.experimental.pallas import tpu as pltpu


def _round_up(x, m):
    return ((x + m - 1) // m) * m


def vqa_head_kernel(q_pool_ref, img_ref,
                    wimg_ref,
                    wp_ref, bp_ref,
                    wfc_ref, bfc_ref,
                    wlin_ref, blin_ref,
                    gamma_ref, beta_ref,
                    wout_ref, bout_ref,
                    out_ref):
    f32 = jnp.float32
    bf16 = jnp.bfloat16

    # --- BERT pooler (dense + tanh) -> q_f : [Bp, dim_i] ---
    q_f = jnp.tanh(
        jnp.dot(q_pool_ref[...], wp_ref[...], preferred_element_type=f32)
        + bp_ref[...])

    # --- fused stand-in image backbone projection -> [Bp, FEAT] ---
    img_feat = jnp.dot(img_ref[...], wimg_ref[...], preferred_element_type=f32)

    # --- i_model.fc + tanh (i_drop p=0.25 is identity in eval) -> [Bp, dim_i] ---
    i_f = jnp.tanh(
        jnp.dot(img_feat.astype(bf16), wfc_ref[...], preferred_element_type=f32)
        + bfc_ref[...])

    # --- fusion ---
    uni_f = i_f * q_f                                            # [Bp, dim_i] f32

    # --- self.linear -> [Bp, dim_h] ---
    h = (jnp.dot(uni_f.astype(bf16), wlin_ref[...], preferred_element_type=f32)
         + blin_ref[...])

    # --- self.h_layer_norm (eps = 1e-5), single-pass statistics ---
    mu = jnp.mean(h, axis=-1, keepdims=True)
    var = jnp.mean(h * h, axis=-1, keepdims=True) - mu * mu
    h = (h - mu) * jax.lax.rsqrt(var + 1e-5) * gamma_ref[...] + beta_ref[...]

    # --- self.drop (p=0.2) identity in eval; self.relu ---
    h = jnp.maximum(h, 0.0)

    # --- self.out_linear -> [Bp, num_target_padded] (lane-dense store) ---
    out_ref[...] = (jnp.dot(h.astype(bf16), wout_ref[...], preferred_element_type=f32)
                    + bout_ref[...])


def vqa_head(q_pooled, image_flat, params, num_target):
    """q_pooled: [B, dim_i] f32, image_flat: [B, C*H*W] f32."""
    B = q_pooled.shape[0]
    B_PAD = max(8, _round_up(B, 8))          # fill vreg sublanes / MXU rows
    N_PAD = _round_up(num_target, 128)       # lane-dense output store

    bf16 = jnp.bfloat16
    f32 = jnp.float32

    def pad_rows(x, rows):
        return jnp.pad(x, ((0, rows - x.shape[0]), (0, 0)))

    q_p = pad_rows(q_pooled, B_PAD).astype(bf16)
    im_p = pad_rows(image_flat, B_PAD).astype(bf16)

    w_out = jnp.pad(params["w_out"], ((0, 0), (0, N_PAD - num_target))).astype(bf16)
    b_out = jnp.pad(params["b_out"], ((0, 0), (0, N_PAD - num_target))).astype(f32)

    inputs = (q_p, im_p,
              params["w_img"].astype(bf16),
              params["w_pool"].astype(bf16), params["b_pool"].astype(f32),
              params["w_fc"].astype(bf16), params["b_fc"].astype(f32),
              params["w_lin"].astype(bf16), params["b_lin"].astype(f32),
              params["gamma"].astype(f32), params["beta"].astype(f32),
              w_out, b_out)

    vmem_spec = pl.BlockSpec(memory_space=pltpu.MemorySpace.VMEM)

    out = pl.pallas_call(
        vqa_head_kernel,
        out_shape=jax.ShapeDtypeStruct((B_PAD, N_PAD), f32),
        in_specs=[vmem_spec] * len(inputs),
        out_specs=vmem_spec,
    )(*inputs)

    return out[:B, :num_target]


def reference_head(q_pooled, image_flat, p):
    """Pure-JAX reference with the same bf16 matmul inputs / f32 accumulation."""
    bf16 = jnp.bfloat16
    f32 = jnp.float32
    q_f = jnp.tanh(jnp.dot(q_pooled.astype(bf16), p["w_pool"].astype(bf16),
                           preferred_element_type=f32) + p["b_pool"])
    img_feat = jnp.dot(image_flat.astype(bf16), p["w_img"].astype(bf16),
                       preferred_element_type=f32)
    i_f = jnp.tanh(jnp.dot(img_feat.astype(bf16), p["w_fc"].astype(bf16),
                           preferred_element_type=f32) + p["b_fc"])
    uni = i_f * q_f
    h = jnp.dot(uni.astype(bf16), p["w_lin"].astype(bf16),
                preferred_element_type=f32) + p["b_lin"]
    mu = h.mean(-1, keepdims=True)
    var = (h * h).mean(-1, keepdims=True) - mu * mu
    h = (h - mu) * jax.lax.rsqrt(var + 1e-5) * p["gamma"] + p["beta"]
    h = jnp.maximum(h, 0.0)
    return jnp.dot(h.astype(bf16), p["w_out"].astype(bf16),
                   preferred_element_type=f32) + p["b_out"]


if __name__ == "__main__":
    # Small, forward-consistent shapes.
    B = 2                 # batch
    S = 8                 # token sequence length
    C, H, W = 3, 16, 16   # NCHW image
    VOCAB = 1000
    DIM_I = 256           # text hidden dim (so i_f * q_f broadcasts exactly)
    DIM_H = 256           # dim_h (1024 in the original, scaled down)
    FEAT = 128            # stand-in for ResNet-50's 2048-dim pooled feature
    NUM_TARGET = 64

    key = jax.random.PRNGKey(0)
    ks = jax.random.split(key, 12)

    # ---- example inputs (deterministic) ----
    idx = jax.random.randint(ks[0], (B, S), 0, VOCAB, dtype=jnp.int32)
    mask = jnp.concatenate(
        [jnp.ones((B, S - 2), jnp.float32),
         jnp.array([[1.0, 1.0], [1.0, 0.0]], jnp.float32)], axis=1)   # [B, S]
    image = jax.random.normal(ks[1], (B, C, H, W), dtype=jnp.float32)

    # ---- deterministic parameters (synthetic; no checkpoint loading) ----
    s = 0.05
    params = dict(
        w_pool=s * jax.random.normal(ks[2], (DIM_I, DIM_I), jnp.float32),
        b_pool=s * jax.random.normal(ks[3], (1, DIM_I), jnp.float32),
        w_fc=s * jax.random.normal(ks[4], (FEAT, DIM_I), jnp.float32),
        b_fc=s * jax.random.normal(ks[5], (1, DIM_I), jnp.float32),
        w_lin=s * jax.random.normal(ks[6], (DIM_I, DIM_H), jnp.float32),
        b_lin=s * jax.random.normal(ks[7], (1, DIM_H), jnp.float32),
        gamma=jnp.ones((1, DIM_H), jnp.float32),
        beta=jnp.zeros((1, DIM_H), jnp.float32),
        w_out=s * jax.random.normal(ks[8], (DIM_H, NUM_TARGET), jnp.float32),
        b_out=s * jax.random.normal(ks[9], (1, NUM_TARGET), jnp.float32),
        # Stand-in image backbone projection (fused into the kernel).
        w_img=s * jax.random.normal(ks[11], (C * H * W, FEAT), jnp.float32),
    )
    embed_table = s * jax.random.normal(ks[10], (VOCAB, DIM_I), jnp.float32)

    # ---- plain-JAX glue: stand-in feature extractors ----
    # TODO(synk): xlm-roberta-base encoder replaced by masked-mean of embeddings.
    tok = embed_table[idx]                                        # [B, S, DIM_I]
    m = mask[..., None]
    q_pooled = (tok * m).sum(1) / jnp.maximum(m.sum(1), 1.0)       # [B, DIM_I]
    # TODO(synk): ResNet-50 conv stack replaced by flatten + fixed projection
    #             (the projection matmul itself is fused into the Pallas kernel).
    image_flat = image.reshape(B, C * H * W)                       # [B, C*H*W]

    # ---- run the Pallas kernel ----
    out = vqa_head(q_pooled, image_flat, params, NUM_TARGET)
    out = jax.block_until_ready(out)

    # correctness check against a pure-JAX reference with the same precision policy
    ref = reference_head(q_pooled, image_flat, params)
    assert out.shape == (B, NUM_TARGET)
    assert jnp.allclose(out, ref, atol=2e-2, rtol=2e-2), "mismatch vs reference"

    print("KERNEL_OK")
</pallas_src>

<mosaic_0001>
module attributes {stable_mosaic.version = 11 : i64} {
  func.func @vqa_head_kernel(%arg0: memref<8x256xbf16, #tpu.memory_space<vmem>>, %arg1: memref<8x768xbf16, #tpu.memory_space<vmem>>, %arg2: memref<768x128xbf16, #tpu.memory_space<vmem>>, %arg3: memref<256x256xbf16, #tpu.memory_space<vmem>>, %arg4: memref<1x256xf32, #tpu.memory_space<vmem>>, %arg5: memref<128x256xbf16, #tpu.memory_space<vmem>>, %arg6: memref<1x256xf32, #tpu.memory_space<vmem>>, %arg7: memref<256x256xbf16, #tpu.memory_space<vmem>>, %arg8: memref<1x256xf32, #tpu.memory_space<vmem>>, %arg9: memref<1x256xf32, #tpu.memory_space<vmem>>, %arg10: memref<1x256xf32, #tpu.memory_space<vmem>>, %arg11: memref<256x128xbf16, #tpu.memory_space<vmem>>, %arg12: memref<1x128xf32, #tpu.memory_space<vmem>>, %arg13: memref<8x128xf32, #tpu.memory_space<vmem>>) attributes {dimension_semantics = [], scalar_prefetch = 0 : i64, scratch_operands = 0 : i64, tpu.core_type = #tpu.core_type<tc>} {
    %c0 = arith.constant 0 : index
    %c0_0 = arith.constant 0 : index
    %0 = vector.load %arg0[%c0, %c0_0] : memref<8x256xbf16, #tpu.memory_space<vmem>>, vector<8x256xbf16>
    %c0_1 = arith.constant 0 : index
    %c0_2 = arith.constant 0 : index
    %1 = vector.load %arg3[%c0_1, %c0_2] : memref<256x256xbf16, #tpu.memory_space<vmem>>, vector<256x256xbf16>
    %cst = arith.constant dense<0.000000e+00> : vector<8x256xf32>
    %2 = tpu.matmul %0, %1, %cst {dimension_numbers = #tpu.dot_dimension_numbers<[1], [0], [0], [1], [0, 0, 1, 1], [], []>} : vector<8x256xbf16>, vector<256x256xbf16>, vector<8x256xf32> -> vector<8x256xf32>
    %c0_3 = arith.constant 0 : index
    %c0_4 = arith.constant 0 : index
    %3 = vector.load %arg4[%c0_3, %c0_4] : memref<1x256xf32, #tpu.memory_space<vmem>>, vector<1x256xf32>
    %4 = vector.broadcast %3 : vector<1x256xf32> to vector<8x256xf32>
    %5 = arith.addf %2, %4 : vector<8x256xf32>
    %6 = math.tanh %5 : vector<8x256xf32>
    %c0_5 = arith.constant 0 : index
    %c0_6 = arith.constant 0 : index
    %7 = vector.load %arg1[%c0_5, %c0_6] : memref<8x768xbf16, #tpu.memory_space<vmem>>, vector<8x768xbf16>
    %c0_7 = arith.constant 0 : index
    %c0_8 = arith.constant 0 : index
    %8 = vector.load %arg2[%c0_7, %c0_8] : memref<768x128xbf16, #tpu.memory_space<vmem>>, vector<768x128xbf16>
    %cst_9 = arith.constant dense<0.000000e+00> : vector<8x128xf32>
    %9 = tpu.matmul %7, %8, %cst_9 {dimension_numbers = #tpu.dot_dimension_numbers<[1], [0], [0], [1], [0, 0, 1, 1], [], []>} : vector<8x768xbf16>, vector<768x128xbf16>, vector<8x128xf32> -> vector<8x128xf32>
    %10 = arith.truncf %9 : vector<8x128xf32> to vector<8x128xbf16>
    %c0_10 = arith.constant 0 : index
    %c0_11 = arith.constant 0 : index
    %11 = vector.load %arg5[%c0_10, %c0_11] : memref<128x256xbf16, #tpu.memory_space<vmem>>, vector<128x256xbf16>
    %cst_12 = arith.constant dense<0.000000e+00> : vector<8x256xf32>
    %12 = tpu.matmul %10, %11, %cst_12 {dimension_numbers = #tpu.dot_dimension_numbers<[1], [0], [0], [1], [0, 0, 1, 1], [], []>} : vector<8x128xbf16>, vector<128x256xbf16>, vector<8x256xf32> -> vector<8x256xf32>
    %c0_13 = arith.constant 0 : index
    %c0_14 = arith.constant 0 : index
    %13 = vector.load %arg6[%c0_13, %c0_14] : memref<1x256xf32, #tpu.memory_space<vmem>>, vector<1x256xf32>
    %14 = vector.broadcast %13 : vector<1x256xf32> to vector<8x256xf32>
    %15 = arith.addf %12, %14 : vector<8x256xf32>
    %16 = math.tanh %15 : vector<8x256xf32>
    %17 = arith.mulf %16, %6 : vector<8x256xf32>
    %18 = arith.truncf %17 : vector<8x256xf32> to vector<8x256xbf16>
    %c0_15 = arith.constant 0 : index
    %c0_16 = arith.constant 0 : index
    %19 = vector.load %arg7[%c0_15, %c0_16] : memref<256x256xbf16, #tpu.memory_space<vmem>>, vector<256x256xbf16>
    %cst_17 = arith.constant dense<0.000000e+00> : vector<8x256xf32>
    %20 = tpu.matmul %18, %19, %cst_17 {dimension_numbers = #tpu.dot_dimension_numbers<[1], [0], [0], [1], [0, 0, 1, 1], [], []>} : vector<8x256xbf16>, vector<256x256xbf16>, vector<8x256xf32> -> vector<8x256xf32>
    %c0_18 = arith.constant 0 : index
    %c0_19 = arith.constant 0 : index
    %21 = vector.load %arg8[%c0_18, %c0_19] : memref<1x256xf32, #tpu.memory_space<vmem>>, vector<1x256xf32>
    %22 = vector.broadcast %21 : vector<1x256xf32> to vector<8x256xf32>
    %23 = arith.addf %20, %22 : vector<8x256xf32>
    %cst_20 = arith.constant dense<0.000000e+00> : vector<8xf32>
    %24 = vector.multi_reduction <add>, %23, %cst_20 [1] : vector<8x256xf32> to vector<8xf32>
    %25 = vector.shape_cast %24 : vector<8xf32> to vector<8x1xf32>
    %cst_21 = arith.constant 2.560000e+02 : f32
    %26 = vector.broadcast %cst_21 : f32 to vector<8x1xf32>
    %27 = arith.divf %25, %26 : vector<8x1xf32>
    %28 = arith.mulf %23, %23 : vector<8x256xf32>
    %cst_22 = arith.constant dense<0.000000e+00> : vector<8xf32>
    %29 = vector.multi_reduction <add>, %28, %cst_22 [1] : vector<8x256xf32> to vector<8xf32>
    %30 = vector.shape_cast %29 : vector<8xf32> to vector<8x1xf32>
    %cst_23 = arith.constant 2.560000e+02 : f32
    %31 = vector.broadcast %cst_23 : f32 to vector<8x1xf32>
    %32 = arith.divf %30, %31 : vector<8x1xf32>
    %33 = arith.mulf %27, %27 : vector<8x1xf32>
    %34 = arith.subf %32, %33 : vector<8x1xf32>
    %35 = vector.broadcast %27 : vector<8x1xf32> to vector<8x256xf32>
    %36 = arith.subf %23, %35 : vector<8x256xf32>
    %cst_24 = arith.constant 9.99999974E-6 : f32
    %37 = vector.broadcast %cst_24 : f32 to vector<8x1xf32>
    %38 = arith.addf %34, %37 : vector<8x1xf32>
    %39 = math.rsqrt %38 : vector<8x1xf32>
    %40 = vector.broadcast %39 : vector<8x1xf32> to vector<8x256xf32>
    %41 = arith.mulf %36, %40 : vector<8x256xf32>
    %c0_25 = arith.constant 0 : index
    %c0_26 = arith.constant 0 : index
    %42 = vector.load %arg9[%c0_25, %c0_26] : memref<1x256xf32, #tpu.memory_space<vmem>>, vector<1x256xf32>
    %43 = vector.broadcast %42 : vector<1x256xf32> to vector<8x256xf32>
    %44 = arith.mulf %41, %43 : vector<8x256xf32>
    %c0_27 = arith.constant 0 : index
    %c0_28 = arith.constant 0 : index
    %45 = vector.load %arg10[%c0_27, %c0_28] : memref<1x256xf32, #tpu.memory_space<vmem>>, vector<1x256xf32>
    %46 = vector.broadcast %45 : vector<1x256xf32> to vector<8x256xf32>
    %47 = arith.addf %44, %46 : vector<8x256xf32>
    %cst_29 = arith.constant 0.000000e+00 : f32
    %48 = vector.broadcast %cst_29 : f32 to vector<8x256xf32>
    %49 = arith.maximumf %47, %48 : vector<8x256xf32>
    %50 = arith.truncf %49 : vector<8x256xf32> to vector<8x256xbf16>
    %c0_30 = arith.constant 0 : index
    %c0_31 = arith.constant 0 : index
    %51 = vector.load %arg11[%c0_30, %c0_31] : memref<256x128xbf16, #tpu.memory_space<vmem>>, vector<256x128xbf16>
    %cst_32 = arith.constant dense<0.000000e+00> : vector<8x128xf32>
    %52 = tpu.matmul %50, %51, %cst_32 {dimension_numbers = #tpu.dot_dimension_numbers<[1], [0], [0], [1], [0, 0, 1, 1], [], []>} : vector<8x256xbf16>, vector<256x128xbf16>, vector<8x128xf32> -> vector<8x128xf32>
    %c0_33 = arith.constant 0 : index
    %c0_34 = arith.constant 0 : index
    %53 = vector.load %arg12[%c0_33, %c0_34] : memref<1x128xf32, #tpu.memory_space<vmem>>, vector<1x128xf32>
    %54 = vector.broadcast %53 : vector<1x128xf32> to vector<8x128xf32>
    %55 = arith.addf %52, %54 : vector<8x128xf32>
    %c0_35 = arith.constant 0 : index
    %c0_36 = arith.constant 0 : index
    %56 = vector.load %arg13[%c0_35, %c0_36] : memref<8x128xf32, #tpu.memory_space<vmem>>, vector<8x128xf32>
    tpu.vector_store %arg13[%c0_35, %c0_36], %55 {strides = array<i32>} : memref<8x128xf32, #tpu.memory_space<vmem>>, vector<8x128xf32>,
    return
  }
}

</mosaic_0001>

<bundles_post_ra>
// kernel: tpu_custom_call.1
= control target key start
LH: loop header
LB: loop body
LE: loop exit
PB: predicated region body
PF: predicated region fallthrough
CT: control target
= control target key end

     0   :  { %18 = vsyncpa [#allocation3], 0  ;;  %s2441_s0 = inlined_call_operand.hbm [shape: bf16[8,256], index: 0, kind: input, shape index: {}]   ;;  %s2442_s1 = inlined_call_operand.hbm [shape: bf16[8,768], index: 1, kind: input, shape index: {}]   ;;  %s2443_s2 = inlined_call_operand.hbm [shape: bf16[768,128], index: 2, kind: input, shape index: {}]   ;;  %s2444_s3 = inlined_call_operand.hbm [shape: bf16[256,256], index: 3, kind: input, shape index: {}]   ;;  %s2445_s4 = inlined_call_operand.vmem [shape: f32[1,256], index: 4, kind: input, shape index: {}]   ;;  %s2446_s5 = inlined_call_operand.hbm [shape: bf16[128,256], index: 5, kind: input, shape index: {}]   ;;  %s2447_s6 = inlined_call_operand.vmem [shape: f32[1,256], index: 6, kind: input, shape index: {}]   ;;  %s2448_s7 = inlined_call_operand.hbm [shape: bf16[256,256], index: 7, kind: input, shape index: {}]   ;;  %s2449_s8 = inlined_call_operand.vmem [shape: f32[1,256], index: 8, kind: input, shape index: {}]   ;;  %s2450_s9 = inlined_call_operand.vmem [shape: f32[1,256], index: 9, kind: input, shape index: {}]   ;;  %s2451_s10 = inlined_call_operand.vmem [shape: f32[1,256], index: 10, kind: input, shape index: {}]   ;;  %s2452_s11 = inlined_call_operand.hbm [shape: bf16[256,128], index: 11, kind: input, shape index: {}]   ;;  %s2453_s12 = inlined_call_operand.vmem [shape: f32[1,128], index: 12, kind: input, shape index: {}]   ;;  %s2454_s13 = inlined_call_operand.hbm [shape: f32[8,128], index: 13, kind: output, shape index: {}]  }
   0x1   :  { %19 = vsyncpa [#allocation6], 0 }
   0x2   :  { %20 = vsyncpa [#allocation9], 0 }
   0x3   :  { %21 = vsyncpa [#allocation12], 0 }
   0x4   :  { %22 = vsyncpa [#allocation4], 0  ;;  %s2208_s25 = smov [#allocation5]   ;;  %s2209_s27 = smov [#allocation8]  }
   0x5   :  { %s39_s26 = sshll.u32 %s2208_s25, 4  ;;  %s60_s28 = sshll.u32 %s2209_s27, 4  ;;  %s40_s26 = int_to_ptr.vmem [resolvable:$true] %s39_s26  ;;  %s2291_s28 = int_to_ptr.vmem [resolvable:$true] %s60_s28 }
   0x6   :  { %s2022_s14 = scalar_lea.hbm %s2442_s1, 384 }
   0x7   :  { %p2023_p0 = scmp.ne.s32.totalorder %s2442_s1, %s2022_s14  ;;  %p2026_p1 = scmp.lt.u32.totalorder %s2022_s14, %s2442_s1 }
   0x9   :  { %p2028_p2 = pnand %p2026_p1, %p2023_p0 }
   0xb   :  { %2031 = shalt.err (!%p2028_p2)
}
   0xc   :  { %s2032_s19 = scalar_lea.vmem %s40_s26, 384  ;;  %p2037_p4 = scmp.lt.s32.totalorder %s40_s26, %s40_s26 }
   0xd   :  { %p2033_p3 = scmp.ne.s32.totalorder %s40_s26, %s2032_s19  ;;  %p2038_p5 = scmp.lt.s32.totalorder %s2032_s19, %s2032_s19 }
   0xf   :  { %p2039_p6 = por %p2038_p5, %p2037_p4 }
  0x11   :  { %p2040_p7 = pnand %p2039_p6, %p2033_p3 }
  0x13   :  { %2043 = shalt.err (!%p2040_p7)
}
  0x14   :  { %42 = dma.hbm_to_vmem [thread:$0]  %s2442_s1, 384, %s40_s26, [#allocation6]  }
  0x15   :  { %s2044_s24 = scalar_lea.hbm %s2444_s3, 4096 }
  0x16   :  { %p2045_p8 = scmp.ne.s32.totalorder %s2444_s3, %s2044_s24  ;;  %p2048_p9 = scmp.lt.u32.totalorder %s2044_s24, %s2444_s3 }
  0x18   :  { %p2050_p10 = pnand %p2048_p9, %p2045_p8 }
  0x1a   :  { %2053 = shalt.err (!%p2050_p10)
}
  0x1b   :  { %s2054_s14 = scalar_lea.vmem %s2291_s28, 4096  ;;  %p2059_p12 = scmp.lt.s32.totalorder %s2291_s28, %s2291_s28 }
  0x1c   :  { %p2055_p11 = scmp.ne.s32.totalorder %s2291_s28, %s2054_s14  ;;  %p2060_p13 = scmp.lt.s32.totalorder %s2054_s14, %s2054_s14 }
  0x1e   :  { %p2061_p0 = por %p2060_p13, %p2059_p12 }
  0x20   :  { %p2062_p1 = pnand %p2061_p0, %p2055_p11 }
  0x22   :  { %2065 = shalt.err (!%p2062_p1)
}
  0x23   :  { %s2210_s1 = smov 128   ;;  %s2211_s26 = smov 8  }
  0x24   :  { %66 = dma.hbm_to_vmem [thread:$0]  %s2444_s3, 4096, %s2291_s28, [#allocation9], %s2210_s1, %s2210_s1, %s2211_s26  }
  0x25   :  { %s2212_s17 = smov [#allocation11]   ;;  %s2213_s19 = smov [#allocation2]  }
  0x26   :  { %s88_s18 = sshll.u32 %s2212_s17, 4  ;;  %s29_s20 = sshll.u32 %s2213_s19, 4  ;;  %s89_s18 = int_to_ptr.vmem [resolvable:$true] %s88_s18  ;;  %s30_s20 = int_to_ptr.vmem [resolvable:$true] %s29_s20 }
  0x27   :  { %s2066_s23 = scalar_lea.hbm %s2448_s7, 4096 }
  0x28   :  { %p2067_p2 = scmp.ne.s32.totalorder %s2448_s7, %s2066_s23  ;;  %p2070_p3 = scmp.lt.u32.totalorder %s2066_s23, %s2448_s7 }
  0x2a   :  { %p2072_p4 = pnand %p2070_p3, %p2067_p2 }
  0x2c   :  { %2075 = shalt.err (!%p2072_p4)
}
  0x2d   :  { %s2076_s3 = scalar_lea.vmem %s89_s18, 4096  ;;  %p2081_p6 = scmp.lt.s32.totalorder %s89_s18, %s89_s18 }
  0x2e   :  { %p2077_p5 = scmp.ne.s32.totalorder %s89_s18, %s2076_s3  ;;  %p2082_p7 = scmp.lt.s32.totalorder %s2076_s3, %s2076_s3 }
  0x30   :  { %p2083_p8 = por %p2082_p7, %p2081_p6 }
  0x32   :  { %p2084_p9 = pnand %p2083_p8, %p2077_p5 }
  0x34   :  { %2087 = shalt.err (!%p2084_p9)
}
  0x35   :  { %94 = dma.hbm_to_vmem [thread:$0]  %s2448_s7, 4096, %s89_s18, [#allocation12], %s2210_s1, %s2210_s1, %s2211_s26  }
  0x36   :  { %s2088_s16 = scalar_lea.hbm %s2441_s0, 128 }
  0x37   :  { %p2089_p10 = scmp.ne.s32.totalorder %s2441_s0, %s2088_s16  ;;  %p2092_p11 = scmp.lt.u32.totalorder %s2088_s16, %s2441_s0 }
  0x39   :  { %p2094_p12 = pnand %p2092_p11, %p2089_p10 }
  0x3b   :  { %2097 = shalt.err (!%p2094_p12)
}
  0x3c   :  { %s2098_s23 = scalar_lea.vmem %s30_s20, 128  ;;  %p2103_p0 = scmp.lt.s32.totalorder %s30_s20, %s30_s20 }
  0x3d   :  { %p2099_p13 = scmp.ne.s32.totalorder %s30_s20, %s2098_s23  ;;  %p2104_p1 = scmp.lt.s32.totalorder %s2098_s23, %s2098_s23 }
  0x3f   :  { %p2105_p2 = por %p2104_p1, %p2103_p0 }
  0x41   :  { %p2106_p3 = pnand %p2105_p2, %p2099_p13 }
  0x43   :  { %2109 = shalt.err (!%p2106_p3)
}
  0x44   :  { %32 = dma.hbm_to_vmem [thread:$0]  %s2441_s0, 128, %s30_s20, [#allocation3]  }
  0x45   :  { %s2214_s24 = smov [#allocation7]   ;;  %s2110_s3 = scalar_lea.hbm %s2443_s2, 6144 }
  0x46   :  { %s48_s25 = sshll.u32 %s2214_s24, 4  ;;  %p2111_p4 = scmp.ne.s32.totalorder %s2443_s2, %s2110_s3  ;;  %s49_s25 = int_to_ptr.vmem [resolvable:$true] %s48_s25 }
  0x47   :  { %p2114_p5 = scmp.lt.u32.totalorder %s2110_s3, %s2443_s2 }
  0x49   :  { %p2116_p6 = pnand %p2114_p5, %p2111_p4 }
  0x4b   :  { %2119 = shalt.err (!%p2116_p6)
}
  0x4c   :  { %s2120_s16 = scalar_lea.vmem %s49_s25, 6144  ;;  %p2125_p8 = scmp.lt.s32.totalorder %s49_s25, %s49_s25 }
  0x4d   :  { %p2121_p7 = scmp.ne.s32.totalorder %s49_s25, %s2120_s16  ;;  %p2126_p9 = scmp.lt.s32.totalorder %s2120_s16, %s2120_s16 }
  0x4f   :  { %p2127_p10 = por %p2126_p9, %p2125_p8 }
  0x51   :  { %p2128_p11 = pnand %p2127_p10, %p2121_p7 }
  0x53   :  { %2131 = shalt.err (!%p2128_p11)
}
  0x54   :  { %s2215_s0 = smov 64   ;;  %s2216_s20 = smov 4  }
  0x55   :  { %54 = dma.hbm_to_vmem [thread:$0]  %s2443_s2, 6144, %s49_s25, [#allocation6], %s2215_s0, %s2215_s0, %s2216_s20  }
  0x56   :  { %s2217_s21 = smov [#allocation10]   ;;  %s2218_s23 = smov [#allocation13]  }
  0x57   :  { %s74_s22 = sshll.u32 %s2217_s21, 4  ;;  %s106_s7 = sshll.u32 %s2218_s23, 4  ;;  %s75_s22 = int_to_ptr.vmem [resolvable:$true] %s74_s22  ;;  %s107_s7 = int_to_ptr.vmem [resolvable:$true] %s106_s7 }
  0x58   :  { %s2132_s27 = scalar_lea.hbm %s2446_s5, 2048 }
  0x59   :  { %p2133_p12 = scmp.ne.s32.totalorder %s2446_s5, %s2132_s27  ;;  %p2136_p13 = scmp.lt.u32.totalorder %s2132_s27, %s2446_s5 }
  0x5b   :  { %p2138_p0 = pnand %p2136_p13, %p2133_p12 }
  0x5d   :  { %2141 = shalt.err (!%p2138_p0)
}
  0x5e   :  { %s2142_s2 = scalar_lea.vmem %s75_s22, 2048  ;;  %p2147_p2 = scmp.lt.s32.totalorder %s75_s22, %s75_s22 }
  0x5f   :  { %p2143_p1 = scmp.ne.s32.totalorder %s75_s22, %s2142_s2  ;;  %p2148_p3 = scmp.lt.s32.totalorder %s2142_s2, %s2142_s2 }
  0x61   :  { %p2149_p4 = por %p2148_p3, %p2147_p2 }
  0x63   :  { %p2150_p5 = pnand %p2149_p4, %p2143_p1 }
  0x65   :  { %2153 = shalt.err (!%p2150_p5)
}
  0x66   :  { %80 = dma.hbm_to_vmem [thread:$0]  %s2446_s5, 2048, %s75_s22, [#allocation9], %s2210_s1, %s2210_s1, %s2211_s26  }
  0x67   :  { %s2154_s17 = scalar_lea.hbm %s2452_s11, 2048 }
  0x68   :  { %p2155_p6 = scmp.ne.s32.totalorder %s2452_s11, %s2154_s17  ;;  %p2158_p7 = scmp.lt.u32.totalorder %s2154_s17, %s2452_s11 }
  0x6a   :  { %p2160_p8 = pnand %p2158_p7, %p2155_p6 }
  0x6c   :  { %2163 = shalt.err (!%p2160_p8)
}
  0x6d   :  { %s2164_s24 = scalar_lea.vmem %s107_s7, 2048  ;;  %p2169_p10 = scmp.lt.s32.totalorder %s107_s7, %s107_s7 }
  0x6e   :  { %p2165_p9 = scmp.ne.s32.totalorder %s107_s7, %s2164_s24  ;;  %p2170_p11 = scmp.lt.s32.totalorder %s2164_s24, %s2164_s24 }
  0x70   :  { %p2171_p12 = por %p2170_p11, %p2169_p10 }
  0x72   :  { %p2172_p13 = pnand %p2171_p12, %p2165_p9 }
  0x74   :  { %2175 = shalt.err (!%p2172_p13)
}
  0x75   :  { %112 = dma.hbm_to_vmem [thread:$0]  %s2452_s11, 2048, %s107_s7, [#allocation12], %s2215_s0, %s2215_s0, %s2216_s20  }
  0x76   :  { %2198 = dma.done.wait [#allocation3], 128  }
  0x77   :  { %2199 = vsyncadd [#allocation3], 4294967168 }
  0x78   :  { %2200 = dma.done.wait [#allocation6], 6528  }
  0x79   :  { %2201 = vsyncadd [#allocation6], 4294960768 }
  0x7a   :  { %2202 = dma.done.wait [#allocation9], 6144  }
  0x7b   :  { %2203 = vsyncadd [#allocation9], 4294961152 }
  0x7c   :  { %2204 = dma.done.wait [#allocation12], 6144  }
  0x7d   :  { %2205 = vsyncadd [#allocation12], 4294961152  ;;  %v1820_v0 = vld [vmem:[#allocation8 + $0x4] ss:$8 sps:$4 sm:$0xff]   ;;  %v1823_v2 = vld [vmem:[#allocation8] ss:$8 sps:$4 sm:$0xff]  }
  0x7e   :  { %v1822_v1 = vld [vmem:[#allocation7 + $0x40] sm:$0xff]   ;;  %349 = vmatprep.subr.bf16.mxu0 %v1820_v0  ;;  %v1825_v4 = vld [vmem:[#allocation8 + $0x14] ss:$8 sps:$4 sm:$0xff]   ;;  %v1827_v5 = vld [vmem:[#allocation7 + $0x48] sm:$0xff]   ;;  %s2220_s29 = smov [#allocation14]  }
  0x7f   :  { %1719 = vmatprep.subr.bf16.mxu1 %v1822_v1  ;;  %v1824_v3 = vld [vmem:[#allocation7] sm:$0xff]   ;;  %350 = vmatpush1.bf16.msra.mxu0 %v1823_v2  ;;  %v1828_v6 = vld [vmem:[#allocation8 + $0x10] ss:$8 sps:$4 sm:$0xff]   ;;  %v1829_v7 = vld [vmem:[#allocation7 + $0x8] sm:$0xff]   ;;  %s1554_s3 = sshll.u32 %s2220_s29, 4  ;;  %s1555_s3 = int_to_ptr.vmem [resolvable:$true] %s1554_s3 }
  0x80   :  { %1720 = vmatpush3.bf16.msra.mxu1 %v1824_v3  ;;  %351 = vmatprep.subr.bf16.mxu0 %v1825_v4  ;;  %v1830_v8 = vld [vmem:[#allocation8 + $0x24] ss:$8 sps:$4 sm:$0xff]   ;;  %v1832_v9 = vld [vmem:[#allocation7 + $0x50] sm:$0xff]   ;;  %v1833_v10 = vld [vmem:[#allocation8 + $0x20] ss:$8 sps:$4 sm:$0xff]   ;;  %s2176_s28 = scalar_lea.vmem %s1555_s3, 128  ;;  %p2181_p1 = scmp.lt.s32.totalorder %s1555_s3, %s1555_s3 }
  0x81   :  { %1721 = vmatprep.subr.bf16.mxu1 %v1827_v5  ;;  %v1834_v11 = vld [vmem:[#allocation7 + $0x10] sm:$0xff]   ;;  %v1837_v13 = vld [vmem:[#allocation7 + $0x58] sm:$0xff]   ;;  %v1840_v16 = vld [vmem:[#allocation8 + $0x44] ss:$8 sps:$4 sm:$0xff]   ;;  %p2177_p0 = scmp.ne.s32.totalorder %s1555_s3, %s2176_s28  ;;  %p2182_p2 = scmp.lt.s32.totalorder %s2176_s28, %s2176_s28 }
  0x82   :  { %v1835_v12 = vld [vmem:[#allocation8 + $0x34] ss:$8 sps:$4 sm:$0xff]   ;;  %v1838_v14 = vld [vmem:[#allocation8 + $0x30] ss:$8 sps:$4 sm:$0xff]   ;;  %v1842_v17 = vld [vmem:[#allocation7 + $0x60] sm:$0xff]  }
  0x83   :  { %352 = vmatpush1.bf16.msra.mxu0 %v1828_v6  ;;  %v1839_v15 = vld [vmem:[#allocation7 + $0x18] sm:$0xff]   ;;  %v1843_v18 = vld [vmem:[#allocation8 + $0x40] ss:$8 sps:$4 sm:$0xff]   ;;  %v1850_v24 = vld [vmem:[#allocation8 + $0x64] ss:$8 sps:$4 sm:$0xff]   ;;  %p2183_p3 = por %p2182_p2, %p2181_p1 }
  0x84   :  { %1722 = vmatpush3.bf16.msra.mxu1 %v1829_v7  ;;  %353 = vmatprep.subr.bf16.mxu0 %v1830_v8  ;;  %v1844_v19 = vld [vmem:[#allocation7 + $0x20] sm:$0xff]   ;;  %v1845_v20 = vld [vmem:[#allocation8 + $0x54] ss:$8 sps:$4 sm:$0xff]   ;;  %v1847_v21 = vld [vmem:[#allocation7 + $0x68] sm:$0xff]  }
  0x85   :  { %1723 = vmatprep.subr.bf16.mxu1 %v1832_v9  ;;  %v1848_v22 = vld [vmem:[#allocation8 + $0x50] ss:$8 sps:$4 sm:$0xff]   ;;  %v1849_v23 = vld [vmem:[#allocation7 + $0x28] sm:$0xff]   ;;  %v1855_v28 = vld [vmem:[#allocation8 + $0x74] ss:$8 sps:$4 sm:$0xff]   ;;  %p2184_p4 = pnand %p2183_p3, %p2177_p0 }
  0x86   :  { %v1852_v25 = vld [vmem:[#allocation7 + $0x70] sm:$0xff]   ;;  %v1853_v26 = vld [vmem:[#allocation8 + $0x60] ss:$8 sps:$4 sm:$0xff]   ;;  %v1857_v29 = vld [vmem:[#allocation7 + $0x78] sm:$0xff]  }
  0x87   :  { %354 = vmatpush1.bf16.msra.mxu0 %v1833_v10  ;;  %v1854_v27 = vld [vmem:[#allocation7 + $0x30] sm:$0xff]   ;;  %v392_v31 = vld [vmem:[#allocation5] sm:$0xff]  ;;  %v1859_v32 = vld [vmem:[#allocation7 + $0x38] sm:$0xff]  }
  0x88   :  { %1724 = vmatpush3.bf16.msra.mxu1 %v1834_v11  ;;  %355 = vmatprep.subr.bf16.mxu0 %v1835_v12  ;;  %v1858_v30 = vld [vmem:[#allocation8 + $0x70] ss:$8 sps:$4 sm:$0xff]   ;;  %v1601_v33 = vcombine.high %v392_v31, %v392_v31  ;;  %v1860_v34 = vld [vmem:[#allocation8 + $0x84] ss:$8 sps:$4 sm:$0xff]   ;;  %v1600_v36 = vcombine.low %v392_v31, %v392_v31  ;;  %v1865_v37 = vld [vmem:[#allocation8 + $0x80] ss:$8 sps:$4 sm:$0xff]  }
  0x89   :  { %1725 = vmatprep.subr.bf16.mxu1 %v1837_v13  ;;  %v1864_v35 = vld [vmem:[#allocation7 + $0xc0] sm:$0xff]   ;;  %v1867_v39 = vld [vmem:[#allocation8 + $0x94] ss:$8 sps:$4 sm:$0xff]   ;;  %v1869_v40 = vld [vmem:[#allocation7 + $0xc8] sm:$0xff]  }
  0x8a   :  { %832 = vmatprep.mubr.bf16.mxu1 %v1601_v33  ;;  %v1866_v38 = vld [vmem:[#allocation7 + $0x80] sm:$0xff]   ;;  %v1870_v41 = vld [vmem:[#allocation8 + $0x90] ss:$8 sps:$4 sm:$0xff]   ;;  %v1871_v42 = vld [vmem:[#allocation7 + $0x88] sm:$0xff]  }
  0x8b   :  { %356 = vmatpush1.bf16.msra.mxu0 %v1838_v14  ;;  %v1872_v43 = vld [vmem:[#allocation8 + $0xa4] ss:$8 sps:$4 sm:$0xff]   ;;  %v1874_v44 = vld [vmem:[#allocation7 + $0xd0] sm:$0xff]   ;;  %v1875_v45 = vld [vmem:[#allocation8 + $0xa0] ss:$8 sps:$4 sm:$0xff]  }
  0x8c   :  { %1726 = vmatpush3.bf16.msra.mxu1 %v1839_v15  ;;  %357 = vmatprep.subr.bf16.mxu0 %v1840_v16  ;;  %v1876_v46 = vld [vmem:[#allocation7 + $0x90] sm:$0xff]   ;;  %v1879_v48 = vld [vmem:[#allocation7 + $0xd8] sm:$0xff]   ;;  %v1882_v51 = vld [vmem:[#allocation8 + $0xc4] ss:$8 sps:$4 sm:$0xff]  }
  0x8d   :  { %1727 = vmatprep.subr.bf16.mxu1 %v1842_v17  ;;  %v1877_v47 = vld [vmem:[#allocation8 + $0xb4] ss:$8 sps:$4 sm:$0xff]   ;;  %v1880_v49 = vld [vmem:[#allocation8 + $0xb0] ss:$8 sps:$4 sm:$0xff]   ;;  %v1884_v52 = vld [vmem:[#allocation7 + $0xe0] sm:$0xff]  }
  0x8e   :  { %v1881_v50 = vld [vmem:[#allocation7 + $0x98] sm:$0xff]   ;;  %v1885_v53 = vld [vmem:[#allocation8 + $0xc0] ss:$8 sps:$4 sm:$0xff]   ;;  %v1892_v59 = vld [vmem:[#allocation8 + $0xe4] ss:$8 sps:$4 sm:$0xff]  }
  0x8f   :  { %358 = vmatpush1.bf16.msra.mxu0 %v1843_v18  ;;  %v1886_v54 = vld [vmem:[#allocation7 + $0xa0] sm:$0xff]   ;;  %v1887_v55 = vld [vmem:[#allocation8 + $0xd4] ss:$8 sps:$4 sm:$0xff]   ;;  %v1889_v56 = vld [vmem:[#allocation7 + $0xe8] sm:$0xff]  }
  0x90   :  { %1728 = vmatpush3.bf16.msra.mxu1 %v1844_v19  ;;  %359 = vmatprep.subr.bf16.mxu0 %v1845_v20  ;;  %v1890_v57 = vld [vmem:[#allocation8 + $0xd0] ss:$8 sps:$4 sm:$0xff]   ;;  %v1891_v58 = vld [vmem:[#allocation7 + $0xa8] sm:$0xff]   ;;  %v137_v61 = vld [vmem:[#allocation2] sm:$0xff] }
  0x91   :  { %1729 = vmatprep.subr.bf16.mxu1 %v1847_v21  ;;  %v1894_v60 = vld [vmem:[#allocation7 + $0xf0] sm:$0xff]   ;;  %v1567_v62 = vcombine.high %v137_v61, %v137_v61  ;;  %v1895_v0 = vld [vmem:[#allocation8 + $0xe0] ss:$8 sps:$4 sm:$0xff]   ;;  %v1899_v4 = vld [vmem:[#allocation7 + $0xf8] sm:$0xff]   ;;  %v1566_v8 = vcombine.low %v137_v61, %v137_v61 }
  0x92   :  { %v393_v63 = vld [vmem:[#allocation5 + $0x8] sm:$0xff]  ;;  %v1901_v6 = vld [vmem:[#allocation7 + $0xb8] sm:$0xff]   ;;  %v1906_v7 = vld [vmem:[#allocation7 + $0x140] sm:$0xff]  }
  0x93   :  { %360 = vmatpush1.bf16.msra.mxu0 %v1848_v22  ;;  %v1603_v1 = vcombine.high %v393_v63, %v393_v63  ;;  %v1896_v2 = vld [vmem:[#allocation7 + $0xb0] sm:$0xff]   ;;  %381 = vmatprep.mubr.bf16.mxu0 %v1567_v62  ;;  %v1602_v9 = vcombine.low %v393_v63, %v393_v63  ;;  %v1907_v10 = vld [vmem:[#allocation7 + $0x100] sm:$0xff]   ;;  %v1908_v11 = vld [vmem:[#allocation7 + $0x148] sm:$0xff]  }
  0x94   :  { %1730 = vmatpush3.bf16.msra.mxu1 %v1849_v23  ;;  %361 = vmatprep.subr.bf16.mxu0 %v1850_v24  ;;  %v1897_v3 = vld [vmem:[#allocation8 + $0xf4] ss:$8 sps:$4 sm:$0xff]   ;;  %v1900_v5 = vld [vmem:[#allocation8 + $0xf0] ss:$8 sps:$4 sm:$0xff]   ;;  %v1909_v12 = vld [vmem:[#allocation7 + $0x108] sm:$0xff]  }
  0x95   :  { %1731 = vmatprep.subr.bf16.mxu1 %v1852_v25  ;;  %v1910_v13 = vld [vmem:[#allocation7 + $0x150] sm:$0xff]   ;;  %v394_v15 = vld [vmem:[#allocation5 + $0x10] sm:$0xff]  ;;  %v1914_v19 = vld [vmem:[#allocation7 + $0x160] sm:$0xff]  }
  0x96   :  { %v1911_v14 = vld [vmem:[#allocation7 + $0x110] sm:$0xff]   ;;  %v1912_v16 = vld [vmem:[#allocation7 + $0x158] sm:$0xff]   ;;  %v1605_v17 = vcombine.high %v394_v15, %v394_v15  ;;  %v1915_v20 = vld [vmem:[#allocation7 + $0x120] sm:$0xff]  }
  0x97   :  { %362 = vmatpush1.bf16.msra.mxu0 %v1853_v26  ;;  %v1913_v18 = vld [vmem:[#allocation7 + $0x118] sm:$0xff]   ;;  %v1916_v21 = vld [vmem:[#allocation7 + $0x168] sm:$0xff]   ;;  %v1918_v23 = vld [vmem:[#allocation7 + $0x170] sm:$0xff]  }
  0x98   :  { %1732 = vmatpush3.bf16.msra.mxu1 %v1854_v27  ;;  %363 = vmatprep.subr.bf16.mxu0 %v1855_v28  ;;  %v1917_v22 = vld [vmem:[#allocation7 + $0x128] sm:$0xff]   ;;  %v1919_v24 = vld [vmem:[#allocation7 + $0x130] sm:$0xff]   ;;  %v1920_v25 = vld [vmem:[#allocation7 + $0x178] sm:$0xff]   ;;  %v1604_v27 = vcombine.low %v394_v15, %v394_v15 }
  0x99   :  { %1733 = vmatprep.subr.bf16.mxu1 %v1857_v29  ;;  %v1921_v26 = vld [vmem:[#allocation7 + $0x138] sm:$0xff]   ;;  %v1924_v28 = vld [vmem:[#allocation10] ss:$8 sps:$4 sm:$0xff]   ;;  %v1926_v29 = vld [vmem:[#allocation10 + $0x4] ss:$8 sps:$4 sm:$0xff]  }
  0x9a   :  { %v1927_v31 = vld [vmem:[#allocation10 + $0x10] ss:$8 sps:$4 sm:$0xff]   ;;  %v1930_v33 = vld [vmem:[#allocation10 + $0x20] ss:$8 sps:$4 sm:$0xff]   ;;  %v1974_v61 = vld [vmem:[#allocation11 + $0x84] ss:$8 sps:$4 sm:$0xff]  }
  0x9b   :  { %364 = vmatpush1.bf16.msra.mxu0 %v1858_v30  ;;  %v1929_v30 = vld [vmem:[#allocation10 + $0x14] ss:$8 sps:$4 sm:$0xff]   ;;  %v1972_v62 = vld [vmem:[#allocation11 + $0x80] ss:$8 sps:$4 sm:$0xff]  }
  0x9c   :  { %1734 = vmatpush3.bf16.msra.mxu1 %v1859_v32  ;;  %365 = vmatprep.subr.bf16.mxu0 %v1860_v34  ;;  %v1932_v32 = vld [vmem:[#allocation10 + $0x24] ss:$8 sps:$4 sm:$0xff]   ;;  %v1935_v34 = vld [vmem:[#allocation10 + $0x34] ss:$8 sps:$4 sm:$0xff]  }
  0x9d   :  { %1741 = vmatprep.subr.bf16.mxu1 %v1864_v35  ;;  %v1933_v35 = vld [vmem:[#allocation10 + $0x30] ss:$8 sps:$4 sm:$0xff]   ;;  %v1977_v63 = vld [vmem:[#allocation11 + $0x94] ss:$8 sps:$4 sm:$0xff]  }
  0x9f   :  { %366 = vmatpush1.bf16.msra.mxu0 %v1865_v37  ;;  %833 = vmatmul.mubr.bf16.vlgmr.msra.gmra.mrb[0].mxu1 %v1600_v36  ;;  %v1938_v36 = vld [vmem:[#allocation10 + $0x44] ss:$8 sps:$4 sm:$0xff]   ;;  %v1936_v37 = vld [vmem:[#allocation10 + $0x40] ss:$8 sps:$4 sm:$0xff]  }
  0xa0   :  { %1742 = vmatpush3.bf16.msra.mxu1 %v1866_v38  ;;  %367 = vmatprep.subr.bf16.mxu0 %v1867_v39  ;;  %v1941_v38 = vld [vmem:[#allocation10 + $0x54] ss:$8 sps:$4 sm:$0xff]   ;;  %v1939_v39 = vld [vmem:[#allocation10 + $0x50] ss:$8 sps:$4 sm:$0xff]  }
  0xa1   :  { %1743 = vmatprep.subr.bf16.mxu1 %v1869_v40  ;;  %872 = vmatprep.mubr.bf16.mxu1 %v1603_v1  ;;  %v1944_v40 = vld [vmem:[#allocation10 + $0x64] ss:$8 sps:$4 sm:$0xff]  }
  0xa2   :  { %v1980_v1 = vld [vmem:[#allocation11 + $0xa4] ss:$8 sps:$4 sm:$0xff]  }
  0xa3   :  { %368 = vmatpush1.bf16.msra.mxu0 %v1870_v41  ;;  %v1942_v41 = vld [vmem:[#allocation10 + $0x60] ss:$8 sps:$4 sm:$0xff]  }
  0xa4   :  { %1744 = vmatpush3.bf16.msra.mxu1 %v1871_v42  ;;  %369 = vmatprep.subr.bf16.mxu0 %v1872_v43  ;;  %v1947_v42 = vld [vmem:[#allocation10 + $0x74] ss:$8 sps:$4 sm:$0xff]   ;;  %v1945_v43 = vld [vmem:[#allocation10 + $0x70] ss:$8 sps:$4 sm:$0xff]  }
  0xa5   :  { %1745 = vmatprep.subr.bf16.mxu1 %v1874_v44  ;;  %v2219_v44 = vmov 0  }
  0xa7   :  { %370 = vmatpush1.bf16.msra.mxu0 %v1875_v45  ;;  %v1948_v45 = vld [vmem:[#allocation11] ss:$8 sps:$4 sm:$0xff]  }
  0xa8   :  { %1746 = vmatpush3.bf16.msra.mxu1 %v1876_v46  ;;  %371 = vmatprep.subr.bf16.mxu0 %v1877_v47  ;;  %v1950_v46 = vld [vmem:[#allocation11 + $0x4] ss:$8 sps:$4 sm:$0xff]   ;;  %v1953_v47 = vld [vmem:[#allocation11 + $0x14] ss:$8 sps:$4 sm:$0xff]  }
  0xa9   :  { %1747 = vmatprep.subr.bf16.mxu1 %v1879_v48  ;;  %v1951_v48 = vld [vmem:[#allocation11 + $0x10] ss:$8 sps:$4 sm:$0xff]  }
  0xab   :  { %372 = vmatpush1.bf16.msra.mxu0 %v1880_v49  ;;  %v1956_v49 = vld [vmem:[#allocation11 + $0x24] ss:$8 sps:$4 sm:$0xff]  }
  0xac   :  { %1748 = vmatpush3.bf16.msra.mxu1 %v1881_v50  ;;  %373 = vmatprep.subr.bf16.mxu0 %v1882_v51  ;;  %v1954_v50 = vld [vmem:[#allocation11 + $0x20] ss:$8 sps:$4 sm:$0xff]   ;;  %v1959_v51 = vld [vmem:[#allocation11 + $0x34] ss:$8 sps:$4 sm:$0xff]  }
  0xad   :  { %1749 = vmatprep.subr.bf16.mxu1 %v1884_v52  ;;  %v1957_v52 = vld [vmem:[#allocation11 + $0x30] ss:$8 sps:$4 sm:$0xff]  }
  0xaf   :  { %374 = vmatpush1.bf16.msra.mxu0 %v1885_v53  ;;  %v1962_v53 = vld [vmem:[#allocation11 + $0x44] ss:$8 sps:$4 sm:$0xff]  }
  0xb0   :  { %1750 = vmatpush3.bf16.msra.mxu1 %v1886_v54  ;;  %375 = vmatprep.subr.bf16.mxu0 %v1887_v55  ;;  %v1960_v54 = vld [vmem:[#allocation11 + $0x40] ss:$8 sps:$4 sm:$0xff]   ;;  %v1965_v55 = vld [vmem:[#allocation11 + $0x54] ss:$8 sps:$4 sm:$0xff]  }
  0xb1   :  { %1751 = vmatprep.subr.bf16.mxu1 %v1889_v56  ;;  %v1963_v56 = vld [vmem:[#allocation11 + $0x50] ss:$8 sps:$4 sm:$0xff]  }
  0xb3   :  { %376 = vmatpush1.bf16.msra.mxu0 %v1890_v57  ;;  %v1968_v57 = vld [vmem:[#allocation11 + $0x64] ss:$8 sps:$4 sm:$0xff]  }
  0xb4   :  { %1752 = vmatpush3.bf16.msra.mxu1 %v1891_v58  ;;  %377 = vmatprep.subr.bf16.mxu0 %v1892_v59  ;;  %v1966_v58 = vld [vmem:[#allocation11 + $0x60] ss:$8 sps:$4 sm:$0xff]   ;;  %v1971_v59 = vld [vmem:[#allocation11 + $0x74] ss:$8 sps:$4 sm:$0xff]  }
  0xb5   :  { %1753 = vmatprep.subr.bf16.mxu1 %v1894_v60  ;;  %v1969_v60 = vld [vmem:[#allocation11 + $0x70] ss:$8 sps:$4 sm:$0xff]  }
  0xb7   :  { %378 = vmatpush1.bf16.msra.mxu0 %v1895_v0  ;;  %v1975_v0 = vld [vmem:[#allocation11 + $0x90] ss:$8 sps:$4 sm:$0xff]  }
  0xb8   :  { %1754 = vmatpush3.bf16.msra.mxu1 %v1896_v2  ;;  %379 = vmatprep.subr.bf16.mxu0 %v1897_v3  ;;  %v1978_v2 = vld [vmem:[#allocation11 + $0xa0] ss:$8 sps:$4 sm:$0xff]  }
  0xb9   :  { %1755 = vmatprep.subr.bf16.mxu1 %v1899_v4 }
  0xbb   :  { %380 = vmatpush1.bf16.msra.mxu0 %v1900_v5 }
  0xbc   :  { %1756 = vmatpush3.bf16.msra.mxu1 %v1901_v6  ;;  %1763 = vmatprep.subr.bf16.mxu0 %v1906_v7 }
  0xbd   :  { %1029 = vmatprep.subr.bf16.mxu1 %v1926_v29  ;;  %v1989_v29 = vld [vmem:[#allocation11 + $0xd4] ss:$8 sps:$4 sm:$0xff]  }
  0xbe   :  { %382 = vmatmul.mubr.bf16.vlgmr.msra.gmra.mrb[0].mxu0 %v1566_v8 }
  0xbf   :  { %873 = vmatmul.mubr.bf16.vlgmr.msra.gmra.mrb[4].mxu1 %v1602_v9  ;;  %1764 = vmatpush3.bf16.msra.mxu0 %v1907_v10 }
  0xc0   :  { %1765 = vmatprep.subr.bf16.mxu0 %v1908_v11  ;;  %912 = vmatprep.mubr.bf16.mxu0 %v1605_v17 }
  0xc1   :  { %1030 = vmatpush1.bf16.msra.mxu1 %v1924_v28  ;;  %1061 = vmatprep.mubr.bf16.mxu1 %v2219_v44  ;;  %v1984_v28 = vld [vmem:[#allocation11 + $0xc0] ss:$8 sps:$4 sm:$0xff]  }
  0xc2   :  { %1031 = vmatprep.subr.bf16.mxu1 %v1929_v30  ;;  %v1987_v30 = vld [vmem:[#allocation11 + $0xd0] ss:$8 sps:$4 sm:$0xff]  }
  0xc3   :  { %1766 = vmatpush3.bf16.msra.mxu0 %v1909_v12 }
  0xc4   :  { %1767 = vmatprep.subr.bf16.mxu0 %v1910_v13 }
  0xc5   :  { %1032 = vmatpush1.bf16.msra.mxu1 %v1927_v31  ;;  %v1992_v31 = vld [vmem:[#allocation11 + $0xe4] ss:$8 sps:$4 sm:$0xff]  }
  0xc6   :  { %1033 = vmatprep.subr.bf16.mxu1 %v1932_v32  ;;  %v1990_v32 = vld [vmem:[#allocation11 + $0xe0] ss:$8 sps:$4 sm:$0xff]  }
  0xc7   :  { %1768 = vmatpush3.bf16.msra.mxu0 %v1911_v14 }
  0xc8   :  { %1769 = vmatprep.subr.bf16.mxu0 %v1912_v16 }
  0xc9   :  { %1034 = vmatpush1.bf16.msra.mxu1 %v1930_v33  ;;  %v1995_v33 = vld [vmem:[#allocation11 + $0xf4] ss:$8 sps:$4 sm:$0xff]  }
  0xca   :  { %1035 = vmatprep.subr.bf16.mxu1 %v1935_v34  ;;  %v1993_v34 = vld [vmem:[#allocation11 + $0xf0] ss:$8 sps:$4 sm:$0xff]  }
  0xcb   :  { %1770 = vmatpush3.bf16.msra.mxu0 %v1913_v18 }
  0xcc   :  { %1771 = vmatprep.subr.bf16.mxu0 %v1914_v19 }
  0xcd   :  { %1036 = vmatpush1.bf16.msra.mxu1 %v1933_v35  ;;  %v172_v35 = vlaneseq }
  0xce   :  { %1037 = vmatprep.subr.bf16.mxu1 %v1938_v36 }
  0xcf   :  { %1772 = vmatpush3.bf16.msra.mxu0 %v1915_v20  ;;  %v173_v36 = vshrl.u32 %v172_v35, 7 }
  0xd0   :  { %1773 = vmatprep.subr.bf16.mxu0 %v1916_v21 }
  0xd1   :  { %1038 = vmatpush1.bf16.msra.mxu1 %v1936_v37  ;;  %v2397_v37 = vsub.s32 0, %v173_v36 }
  0xd2   :  { %1039 = vmatprep.subr.bf16.mxu1 %v1941_v38  ;;  %v170_v38 = vld [vmem:[%s2445_s4] sm:$0x3] }
  0xd3   :  { %1774 = vmatpush3.bf16.msra.mxu0 %v1917_v22 }
  0xd4   :  { %1775 = vmatprep.subr.bf16.mxu0 %v1918_v23 }
  0xd5   :  { %1040 = vmatpush1.bf16.msra.mxu1 %v1939_v39  ;;  %v2402_v39 = vsub.s32 1, %v173_v36 }
  0xd6   :  { %1041 = vmatprep.subr.bf16.mxu1 %v1944_v40  ;;  %v175_v40 = vrot.slane %v170_v38, %v2397_v37 }
  0xd7   :  { %1776 = vmatpush3.bf16.msra.mxu0 %v1919_v24 }
  0xd8   :  { %1777 = vmatprep.subr.bf16.mxu0 %v1920_v25  ;;  %v1983_v25 = vld [vmem:[#allocation11 + $0xb4] ss:$8 sps:$4 sm:$0xff]  }
  0xd9   :  { %1042 = vmatpush1.bf16.msra.mxu1 %v1942_v41  ;;  %v179_v41 = vrot.slane %v170_v38, %v2402_v39 }
  0xda   :  { %1043 = vmatprep.subr.bf16.mxu1 %v1947_v42  ;;  %v937_v42 = vld [vmem:[%s2447_s6] sm:$0x3] }
  0xdb   :  { %1778 = vmatpush3.bf16.msra.mxu0 %v1921_v26  ;;  %v1981_v26 = vld [vmem:[#allocation11 + $0xb0] ss:$8 sps:$4 sm:$0xff]   ;;  %v942_v44 = vrot.slane %v937_v42, %v2397_v37 }
  0xdc   :  { %1280 = vmatprep.subr.bf16.mxu0 %v1950_v46  ;;  %v946_v46 = vrot.slane %v937_v42, %v2402_v39 }
  0xdd   :  { %1044 = vmatpush1.bf16.msra.mxu1 %v1945_v43 }
  0xde   :  { %913 = vmatmul.mubr.bf16.vlgmr.msra.gmra.mrb[4].mxu0 %v1604_v27  ;;  %v1986_v27 = vld [vmem:[#allocation11 + $0xc4] ss:$8 sps:$4 sm:$0xff]  }
  0xdf   :  { %1281 = vmatpush1.bf16.msra.mxu0 %v1948_v45 }
  0xe0   :  { %1282 = vmatprep.subr.bf16.mxu0 %v1953_v47 }
  0xe3   :  { %1283 = vmatpush1.bf16.msra.mxu0 %v1951_v48 }
  0xe4   :  { %1284 = vmatprep.subr.bf16.mxu0 %v1956_v49 }
  0xe7   :  { %1285 = vmatpush1.bf16.msra.mxu0 %v1954_v50 }
  0xe8   :  { %1286 = vmatprep.subr.bf16.mxu0 %v1959_v51 }
  0xeb   :  { %1287 = vmatpush1.bf16.msra.mxu0 %v1957_v52 }
  0xec   :  { %1288 = vmatprep.subr.bf16.mxu0 %v1962_v53 }
  0xef   :  { %1289 = vmatpush1.bf16.msra.mxu0 %v1960_v54 }
  0xf0   :  { %1290 = vmatprep.subr.bf16.mxu0 %v1965_v55 }
  0xf3   :  { %1291 = vmatpush1.bf16.msra.mxu0 %v1963_v56 }
  0xf4   :  { %1292 = vmatprep.subr.bf16.mxu0 %v1968_v57 }
  0xf7   :  { %1293 = vmatpush1.bf16.msra.mxu0 %v1966_v58 }
  0xf8   :  { %1294 = vmatprep.subr.bf16.mxu0 %v1971_v59 }
  0xfb   :  { %1295 = vmatpush1.bf16.msra.mxu0 %v1969_v60 }
  0xfc   :  { %1296 = vmatprep.subr.bf16.mxu0 %v1974_v61  ;;  %v1108_v61 = vld [vmem:[%s2449_s8] sm:$0x3] }
  0xff   :  { %1297 = vmatpush1.bf16.msra.mxu0 %v1972_v62  ;;  %v1113_v62 = vrot.slane %v1108_v61, %v2397_v37 }
 0x100   :  { %1298 = vmatprep.subr.bf16.mxu0 %v1977_v63  ;;  %v1117_v63 = vrot.slane %v1108_v61, %v2402_v39 }
 0x103   :  { %1299 = vmatpush1.bf16.msra.mxu0 %v1975_v0 }
 0x104   :  { %1300 = vmatprep.subr.bf16.mxu0 %v1980_v1 }
 0x107   :  { %1301 = vmatpush1.bf16.msra.mxu0 %v1978_v2 }
 0x108   :  { %1302 = vmatprep.subr.bf16.mxu0 %v1983_v25  ;;  %v2011_v25 = vld [vmem:[#allocation13 + $0x38] sm:$0xff]  }
 0x10b   :  { %1303 = vmatpush1.bf16.msra.mxu0 %v1981_v26 }
 0x10c   :  { %1304 = vmatprep.subr.bf16.mxu0 %v1986_v27 }
 0x10f   :  { %1305 = vmatpush1.bf16.msra.mxu0 %v1984_v28 }
 0x110   :  { %1306 = vmatprep.subr.bf16.mxu0 %v1989_v29 }
 0x113   :  { %1307 = vmatpush1.bf16.msra.mxu0 %v1987_v30 }
 0x114   :  { %1308 = vmatprep.subr.bf16.mxu0 %v1992_v31 }
 0x117   :  { %1309 = vmatpush1.bf16.msra.mxu0 %v1990_v32 }
 0x118   :  { %1310 = vmatprep.subr.bf16.mxu0 %v1995_v33  ;;  %v1340_v33 = vld [vmem:[%s2450_s9] sm:$0x3] }
 0x119   :  { %v1345_v38 = vrot.slane %v1340_v33, %v2397_v37 }
 0x11b   :  { %1311 = vmatpush1.bf16.msra.mxu0 %v1993_v34  ;;  %v1354_v34 = vld [vmem:[%s2451_s10] sm:$0x3] }
 0x172   :  { %v1735_v3 = vpop.f32.mrb[0].mxu1 }
 0x173   :  { %v1736_v4 = vpop.f32.mrb[1].mxu1 }
 0x174   :  { %v1737_v5 = vadd.f32 %v1736_v4, %v1735_v3  ;;  %v1738_v6 = vpop.f32.mrb[2].mxu1 }
 0x175   :  { %v1739_v7 = vpop.f32.mrb[3].mxu1 }
 0x191   :  { %v383_v8 = vpop.f32.mrb[0].mxu0 }
 0x192   :  { %v1757_v9 = vpop.f32.mrb[4].mxu1  ;;  %v385_v10 = vpop.f32.mrb[1].mxu0  ;;  %v384_v43 = vadd.f32 %v383_v8, %v175_v40  ;;  %v1349_v40 = vrot.slane %v1340_v33, %v2402_v39 }
 0x193   :  { %v1758_v11 = vpop.f32.mrb[5].mxu1  ;;  %v387_v12 = vpop.f32.mrb[2].mxu0  ;;  %v386_v45 = vadd.f32 %v385_v10, %v179_v41  ;;  %v1996_v10 = vld [vmem:[#allocation13 + $0x40] sm:$0xff]  }
 0x194   :  { %v1759_v13 = vadd.f32 %v1758_v11, %v1757_v9  ;;  %v388_v14 = vpop.f32.mrb[3].mxu0  ;;  %v1760_v15 = vpop.f32.mrb[6].mxu1  ;;  %2012 = vtanh.f32 %v384_v43  ;;  %v1997_v11 = vld [vmem:[#allocation13] sm:$0xff]   ;;  %1785 = vmatprep.subr.bf16.mxu1 %v1996_v10  ;;  %v1998_v12 = vld [vmem:[#allocation13 + $0x48] sm:$0xff]   ;;  %v1359_v43 = vrot.slane %v1354_v34, %v2397_v37 }
 0x195   :  { %v1761_v16 = vpop.f32.mrb[7].mxu1  ;;  %2014 = vtanh.f32 %v386_v45  ;;  %v2000_v14 = vld [vmem:[#allocation13 + $0x50] sm:$0xff]  }
 0x196   :  { %v875_v17 = vadd.f32 %v1759_v13, %v1737_v5  ;;  %v1999_v13 = vld [vmem:[#allocation13 + $0x8] sm:$0xff]   ;;  %v2001_v15 = vld [vmem:[#allocation13 + $0x10] sm:$0xff]   ;;  %v2002_v16 = vld [vmem:[#allocation13 + $0x58] sm:$0xff]  }
 0x19e   :  { %v2013_v53 = vpop.eup %2012 }
 0x19f   :  { %v2015_v54 = vpop.eup %2014 }
 0x1b1   :  { %v1779_v18 = vpop.f32.mrb[4].mxu0 }
 0x1b2   :  { %v1780_v19 = vpop.f32.mrb[5].mxu0 }
 0x1b3   :  { %v1781_v20 = vadd.f32 %v1780_v19, %v1779_v18  ;;  %v1782_v21 = vpop.f32.mrb[6].mxu0  ;;  %v2004_v18 = vld [vmem:[#allocation13 + $0x60] sm:$0xff]  }
 0x1b4   :  { %v1783_v22 = vpop.f32.mrb[7].mxu0  ;;  %v2005_v19 = vld [vmem:[#allocation13 + $0x20] sm:$0xff]   ;;  %v2007_v21 = vld [vmem:[#allocation13 + $0x28] sm:$0xff]  }
 0x1b5   :  { %v915_v23 = vadd.f32 %v1781_v20, %v875_v17  ;;  %v2003_v17 = vld [vmem:[#allocation13 + $0x18] sm:$0xff]   ;;  %v2006_v20 = vld [vmem:[#allocation13 + $0x68] sm:$0xff]   ;;  %v2008_v22 = vld [vmem:[#allocation13 + $0x70] sm:$0xff]  }
 0x1b7   :  { %v920_v24 = vpack.c.bf16 %v915_v23, %v915_v23  ;;  %v2009_v23 = vld [vmem:[#allocation13 + $0x30] sm:$0xff]  }
 0x1b9   :  { %1062 = vmatmul.mubr.bf16.vlgmr.msra.gmra.mrb[8].mxu1 %v920_v24  ;;  %v2010_v24 = vld [vmem:[#allocation13 + $0x78] sm:$0xff]  }
 0x1ba   :  { %1786 = vmatpush3.bf16.msra.mxu1 %v1997_v11 }
 0x1bb   :  { %1787 = vmatprep.subr.bf16.mxu1 %v1998_v12 }
 0x1be   :  { %1788 = vmatpush3.bf16.msra.mxu1 %v1999_v13 }
 0x1bf   :  { %1789 = vmatprep.subr.bf16.mxu1 %v2000_v14 }
 0x1c2   :  { %1790 = vmatpush3.bf16.msra.mxu1 %v2001_v15 }
 0x1c3   :  { %1791 = vmatprep.subr.bf16.mxu1 %v2002_v16 }
 0x1c6   :  { %1792 = vmatpush3.bf16.msra.mxu1 %v2003_v17 }
 0x1c7   :  { %1793 = vmatprep.subr.bf16.mxu1 %v2004_v18 }
 0x1ca   :  { %1794 = vmatpush3.bf16.msra.mxu1 %v2005_v19 }
 0x1cb   :  { %1795 = vmatprep.subr.bf16.mxu1 %v2006_v20 }
 0x1ce   :  { %1796 = vmatpush3.bf16.msra.mxu1 %v2007_v21 }
 0x1cf   :  { %1797 = vmatprep.subr.bf16.mxu1 %v2008_v22 }
 0x1d2   :  { %1798 = vmatpush3.bf16.msra.mxu1 %v2009_v23 }
 0x1d3   :  { %1799 = vmatprep.subr.bf16.mxu1 %v2010_v24 }
 0x1d6   :  { %1800 = vmatpush3.bf16.msra.mxu1 %v2011_v25 }
 0x28c   :  { %v1063_v47 = vpop.f32.mrb[8].mxu1 }
 0x28d   :  { %v1064_v48 = vadd.f32 %v1063_v47, %v942_v44  ;;  %v1065_v49 = vpop.f32.mrb[9].mxu1  ;;  %v1363_v44 = vrot.slane %v1354_v34, %v2402_v39 }
 0x28e   :  { %v1066_v50 = vadd.f32 %v1065_v49, %v946_v46  ;;  %v1067_v51 = vpop.f32.mrb[10].mxu1 }
 0x28f   :  { %2016 = vtanh.f32 %v1064_v48  ;;  %v1068_v52 = vpop.f32.mrb[11].mxu1 }
 0x290   :  { %2018 = vtanh.f32 %v1066_v50 }
 0x299   :  { %v2017_v55 = vpop.eup %2016 }
 0x29a   :  { %v2019_v56 = vpop.eup %2018  ;;  %v1072_v57 = vmul.f32 %v2017_v55, %v2013_v53  ;;  %v1702_v55 = vld [vmem:[%s2453_s12] ss:$0 sm:$0xff] }
 0x29b   :  { %v1073_v58 = vmul.f32 %v2019_v56, %v2015_v54 }
 0x29c   :  { %v1074_v60 = vpack.c.bf16 %v1072_v57, %v1072_v57 }
 0x29d   :  { %v1075_v59 = vpack.c.bf16 %v1073_v58, %v1073_v58 }
 0x29f   :  { %1312 = vmatprep.mubr.bf16.mxu0 %v1075_v59 }
 0x2a0   :  { %1313 = vmatmul.mubr.bf16.vlgmr.msra.gmra.mrb[8].mxu0 %v1074_v60 }
 0x373   :  { %v1314_v0 = vpop.f32.mrb[8].mxu0 }
 0x374   :  { %v1315_v1 = vadd.f32 %v1314_v0, %v1113_v62  ;;  %v1316_v2 = vpop.f32.mrb[9].mxu0 }
 0x375   :  { %v1317_v3 = vadd.f32 %v1316_v2, %v1117_v63  ;;  %v1318_v4 = vpop.f32.mrb[10].mxu0 }
 0x376   :  { %v1319_v5 = vpop.f32.mrb[11].mxu0  ;;  %v1326_v7 = vmul.f32 %v1315_v1, %v1315_v1 }
 0x377   :  { %v1321_v6 = vadd.f32 %v1317_v3, %v1315_v1  ;;  %v1327_v8 = vmul.f32 %v1317_v3, %v1317_v3 }
 0x379   :  { %1322 = vadd.xlane.f32.xlu0 %v1321_v6  ;;  %v1328_v9 = vadd.f32 %v1327_v8, %v1326_v7 }
 0x37d   :  { %1329 = vadd.xlane.f32.xlu0 %v1328_v9 }
 0x406   :  { %v1323_v26 = vpop.xlane.xlu0 %1322 }
 0x407   :  { %v1325_v27 = vmul.f32 0.00390625, %v1323_v26 }
 0x409   :  { %v1332_v29 = vmul.f32 %v1325_v27, %v1325_v27  ;;  %v1334_v35 = vsub.f32 %v1315_v1, %v1325_v27  ;;  %v1335_v36 = vsub.f32 %v1317_v3, %v1325_v27 }
 0x40a   :  { %v1330_v28 = vpop.xlane.xlu0 %1329 }
 0x40b   :  { %v1331_v30 = vmul.f32 0.00390625, %v1330_v28 }
 0x40d   :  { %v1333_v31 = vsub.f32 %v1331_v30, %v1332_v29 }
 0x40f   :  { %v1336_v32 = vadd.f32 1e-05, %v1333_v31 }
 0x411   :  { %2020 = vrsqrt.f32 %v1336_v32 }
 0x41b   :  { %v2021_v41 = vpop.eup %2020 }
 0x41c   :  { %v1339_v42 = vmul.f32 %v2021_v41, %v1335_v36  ;;  %v1338_v45 = vmul.f32 %v2021_v41, %v1334_v35 }
 0x41e   :  { %v1353_v46 = vmul.f32 %v1349_v40, %v1339_v42  ;;  %v1352_v47 = vmul.f32 %v1345_v38, %v1338_v45 }
 0x420   :  { %v1367_v48 = vadd.f32 %v1363_v44, %v1353_v46  ;;  %v1366_v49 = vadd.f32 %v1359_v43, %v1352_v47 }
 0x422   :  { %v1369_v50 = vmax.f32 %v1367_v48, 0.0  ;;  %v1368_v51 = vmax.f32 %v1366_v49, 0.0 }
 0x424   :  { %v1371_v52 = vpack.c.bf16 %v1369_v50, %v1369_v50  ;;  %v1370_v53 = vpack.c.bf16 %v1368_v51, %v1368_v51 }
 0x426   :  { %1539 = vmatprep.mubr.bf16.mxu1 %v1371_v52 }
 0x427   :  { %1540 = vmatmul.mubr.bf16.vlgmr.msra.gmra.mrb[12].mxu1 %v1370_v53 }
 0x4fa   :  { %v1801_v54 = vpop.f32.mrb[12].mxu1 }
 0x4fb   :  { %v1802_v56 = vpop.f32.mrb[13].mxu1 }
 0x4fc   :  { %v1803_v37 = vadd.f32 %v1802_v56, %v1801_v54  ;;  %v1804_v39 = vpop.f32.mrb[14].mxu1 }
 0x4fd   :  { %v1805_v57 = vpop.f32.mrb[15].mxu1 }
 0x4fe   :  { %v1542_v58 = vadd.f32 %v1803_v37, %v1702_v55 }
 0x500   :  { %1547 = vst [vmem:[#allocation14] sm:$0xff] %v1542_v58 }
 0x501   :  { %2187 = shalt.err (!%p2184_p4)
}
 0x502   :  { %s2188_s12 = scalar_lea.hbm %s2454_s13, 128 }
 0x503   :  { %p2189_p5 = scmp.ne.s32.totalorder %s2454_s13, %s2188_s12  ;;  %p2192_p6 = scmp.lt.u32.totalorder %s2188_s12, %s2454_s13 }
 0x505   :  { %p2194_p7 = pnand %p2192_p6, %p2189_p5 }
 0x507   :  { %2197 = shalt.err (!%p2194_p7)
}
 0x508   :  { %1557 = dma.vmem_to_hbm [thread:$0]  %s1555_s3, 128, %s2454_s13, [#allocation4]  }
 0x509   :  { %2206 = dma.done.wait [#allocation4], 128  }
 0x50a   :  { %2207 = vsyncadd [#allocation4], 4294967168 }
 0x50b   :  { %1561 = vsyncpa [#allocation3], 1 }
 0x50c   :  { %1562 = vsyncpa [#allocation6], 1 }
 0x50d   :  { %1563 = vsyncpa [#allocation9], 1 }
 0x50e   :  { %1564 = vsyncpa [#allocation12], 1 }
 0x50f   :  { %1565 = vsyncpa [#allocation4], 1 }

</bundles_post_ra>
